<compile_context>
chip_gen: v6e
topology: v6e:2x2x1
jax: 0.10.0
libtpu: 0.0.40
codegen_flags: <defaults>
</compile_context>

<pallas_src>
import functools

import jax
import jax.numpy as jnp
from jax.experimental import pallas as pl
from jax.experimental.pallas import tpu as pltpu


# --------------------------------------------------------------------------- #
# Pallas kernel: per-(frame, channel) reductions on a batched lane-dense slab
# --------------------------------------------------------------------------- #
def _frame_loss_kernel(pred_ref, tgt_ref, out_ref, *, H, W, compute_perceptual):
    """pred_ref / tgt_ref : (F*C, H*W)  original dtype, lane-dense spatial
       out_ref            : (1, 5, F*C) f32
         rows = [sum(diff^2), sum(|diff|), target mean,
                 target std (unbiased), sum((grad_mag_p - grad_mag_t)^2)]
    """
    p = pred_ref[...].astype(jnp.float32)           # (FC, HW)
    t = tgt_ref[...].astype(jnp.float32)
    FC, HW = p.shape
    n = float(H * W)

    diff = p - t
    sq_sum = jnp.sum(diff * diff, axis=1)           # (FC,)
    abs_sum = jnp.sum(jnp.abs(diff), axis=1)        # (FC,)

    # Target per-row mean / unbiased std (two-pass; matches torch .std()).
    tmean_k = jnp.sum(t, axis=1, keepdims=True) * (1.0 / n)    # (FC, 1)
    cent = t - tmean_k
    # TODO(synk): for H*W == 1 torch's unbiased std is NaN; we return 0 (the
    # sample-weight path that consumes std is gated on H, W > 1 anyway).
    inv_nm1 = 1.0 / (n - 1.0) if n > 1.0 else 0.0
    tstd = jnp.sqrt(jnp.sum(cent * cent, axis=1) * inv_nm1)    # (FC,)
    tmean = tmean_k[:, 0]                                      # (FC,)

    if compute_perceptual:
        # Depthwise 3x3 Sobel with zero padding=1, computed separably on the
        # flattened spatial axis.  pred and target are stacked along the
        # sublane axis so all rolls / wheres / sqrt run once on full vregs.
        x = jnp.concatenate([p, t], axis=0)                    # (2*FC, HW)
        flat = jax.lax.broadcasted_iota(jnp.int32, x.shape, 1)
        col = flat % W
        # Hoisted border masks (reused for both pred and target rows).
        m_dn = flat < (H - 1) * W      # reading row i+1 is in-bounds
        m_up = flat >= W               # reading row i-1 is in-bounds
        m_rt = col < (W - 1)           # reading col j+1 is in-bounds
        m_lt = col >= 1                # reading col j-1 is in-bounds

        def shifted(v, elems, mask):   # y[k] = v[k + elems], zero outside image
            return jnp.where(mask, pltpu.roll(v, (-elems) % HW, axis=1), 0.0)

        up = shifted(x, -W, m_up)      # x[i-1, j]
        dn = shifted(x, W, m_dn)       # x[i+1, j]
        s_h = up + 2.0 * x + dn        # [1, 2, 1] smoothing along H
        d_h = dn - up                  # [-1, 0, 1] derivative along H
        gx = shifted(s_h, 1, m_rt) - shifted(s_h, -1, m_lt)
        gy = shifted(d_h, -1, m_lt) + 2.0 * d_h + shifted(d_h, 1, m_rt)
        gm = jnp.sqrt(gx * gx + gy * gy + 1e-6)
        gdiff = gm[:FC] - gm[FC:]
        perc_sum = jnp.sum(gdiff * gdiff, axis=1)              # (FC,)
    else:
        perc_sum = jnp.zeros((FC,), jnp.float32)

    # Single lane-dense store of all five statistic rows.
    out_ref[0] = jnp.stack([sq_sum, abs_sum, tmean, tstd, perc_sum], axis=0)


def _choose_frames_per_block(total_frames, C, HW, itemsize,
                             target_block_bytes=1 << 20):
    """Frames per grid step.  F is a multiple of 8 so the (F*C, HW) block is
    8-sublane aligned; the block targets ~1 MiB per input (conservative for
    v7x's 64 MiB VMEM; v5e/v6e could take 2-4x this), while keeping >= 2 grid
    steps when possible so v7x can shard the parallel axis over both TCs.
    """
    bytes_per_frame = max(1, C * HW * itemsize)
    f = max(8, (target_block_bytes // bytes_per_frame) // 8 * 8)
    if total_frames > 8:
        half = (((total_frames + 1) // 2) + 7) // 8 * 8   # keep >= 2 grid steps
        f = min(f, half)
    f = min(f, (total_frames + 7) // 8 * 8)               # <= padded total
    return int(f)


def _per_frame_stats(pred, target, H, W, compute_perceptual):
    """pred/target: (B, S, C, H, W) -> (B, S, C, 5) per-frame/channel stats."""
    B, S, C = pred.shape[:3]
    HW = H * W
    N = B * S
    itemsize = jnp.dtype(pred.dtype).itemsize
    F = _choose_frames_per_block(N, C, HW, itemsize)
    n_blocks = pl.cdiv(N, F)
    N_pad = n_blocks * F

    pf = pred.reshape(N, C, HW)
    tg = target.reshape(N, C, HW)
    if N_pad != N:
        pad = ((0, N_pad - N), (0, 0), (0, 0))
        pf = jnp.pad(pf, pad)
        tg = jnp.pad(tg, pad)
    pf = pf.reshape(N_pad * C, HW)
    tg = tg.reshape(N_pad * C, HW)

    kernel = functools.partial(_frame_loss_kernel, H=H, W=W,
                               compute_perceptual=compute_perceptual)
    out = pl.pallas_call(
        kernel,
        grid=(n_blocks,),
        in_specs=[
            pl.BlockSpec((F * C, HW), lambda i: (i, 0)),
            pl.BlockSpec((F * C, HW), lambda i: (i, 0)),
        ],
        out_specs=pl.BlockSpec((1, 5, F * C), lambda i: (i, 0, 0)),
        out_shape=jax.ShapeDtypeStruct((n_blocks, 5, F * C), jnp.float32),
        compiler_params=pltpu.CompilerParams(
            dimension_semantics=("parallel",),
            vmem_limit_bytes=32 * 1024 * 1024),
    )(pf, tg)

    # (n_blocks, 5, F*C) -> (N, C, 5) -> (B, S, C, 5)
    stats = out.transpose(0, 2, 1).reshape(N_pad, C, 5)[:N]
    return stats.reshape(B, S, C, 5)


# --------------------------------------------------------------------------- #
# CombinedLoss forward (scalar glue in plain JAX)
# --------------------------------------------------------------------------- #
def combined_loss(pred, valid_mask, target, latent,
                  mse_weight=0.5, l1_weight=0.3, diversity_weight=0.1,
                  latent_l1_weight=0.05, latent_l2_weight=0.05,
                  temporal_decay=0.9, perceptual_weight=0.1,
                  r_weight=1.0, g_weight=1.0, b_weight=1.0,
                  episode_length_scaling=True, use_sample_weights=True):
    pred = jnp.asarray(pred)
    target = jnp.asarray(target)
    latent = jnp.asarray(latent)

    if pred.ndim == 3 and target.ndim == 3:
        pred = pred[..., None, None]
        target = target[..., None, None]
    if pred.ndim == 4 and target.ndim == 4:
        pred = pred[:, None]
        target = target[:, None]
    B, S, C, H, W = pred.shape

    # temporal weights
    tw = temporal_decay ** jnp.arange(S, dtype=jnp.float32)
    tw = tw / tw.sum()
    temporal_weights = jnp.broadcast_to(tw[None, :], (B, S))

    # episode-length weights
    if episode_length_scaling:
        el = valid_mask.astype(jnp.float32).sum(axis=1)
        mn, mx = el.min(), el.max()
        norm = jnp.where(mx > mn,
                         (el - mn) / jnp.where(mx > mn, mx - mn, 1.0),
                         jnp.ones_like(el))
        ew = jax.nn.softplus(norm)
        episode_weights = ew * (float(B) / ew.sum())
    else:
        episode_weights = jnp.ones((B,), jnp.float32)

    compute_perceptual = bool(perceptual_weight > 0 and W > 1 and H > 1)

    # ---- Pallas hot path: batched lane-dense frame slabs, parallel grid ----
    frame_stats = _per_frame_stats(pred, target, H, W, compute_perceptual)
    sq_sums = frame_stats[..., 0]          # (B, S, C)  sum_{hw} diff^2
    abs_sums = frame_stats[..., 1]         # (B, S, C)  sum_{hw} |diff|
    tmean = frame_stats[..., 2]            # (B, S, C)
    tstd = frame_stats[..., 3]             # (B, S, C)
    perc_c = frame_stats[..., 4]           # (B, S, C)  sum_{hw} gdiff^2

    # channel weighting applied after the spatial reduction (cheap, dynamic)
    cw = (jnp.array([r_weight, g_weight, b_weight], jnp.float32)
          if C == 3 else jnp.ones((C,), jnp.float32))
    denom = float(C * H * W)
    mse_bs = (sq_sums * cw).sum(-1) / denom
    l1_bs = (abs_sums * cw).sum(-1) / denom
    perc_bs = perc_c.sum(-1) / denom       # perceptual term is not channel-weighted

    # content sample-weights (running stats == batch stats on the first call)
    # TODO(synk): the torch module keeps momentum-updated running_mean/std
    # buffers; this forward uses batch statistics (exact for the first call).
    if use_sample_weights and W > 1 and H > 1:
        batch_mean = tmean.mean(axis=(0, 1))
        batch_std = tstd.mean(axis=(0, 1))
        total_dev = (jnp.abs(tmean - batch_mean)
                     + jnp.abs(tstd - batch_std)).sum(axis=(1, 2))
        content_weights = total_dev / total_dev.sum()
        sample_weights = content_weights * episode_weights
    else:
        sample_weights = episode_weights

    components = {}
    total = jnp.float32(0.0)

    if mse_weight > 0:
        wm = ((mse_bs * temporal_weights).sum(-1) * sample_weights).mean()
        total = total + mse_weight * wm
        components['mse_scale_0'] = wm
    if l1_weight > 0:
        wl = ((l1_bs * temporal_weights).sum(-1) * sample_weights).mean()
        total = total + l1_weight * wl
        components['l1_scale_0'] = wl
    if compute_perceptual:
        wp = ((perc_bs * temporal_weights).sum(-1) * sample_weights).mean()
        total = total + perceptual_weight * wp
        components['perceptual_scale_0'] = wp
    # TODO(synk): multi-scale avg_pool2d path (num_scales > 1) not implemented;
    # the module's default num_scales=1 only runs scale 0.

    if diversity_weight > 0:
        # torch.cdist of each flattened episode with itself -> all-zero distance
        # matrix, so the term is exactly 0 for B >= 2 (NaN for B == 1, matching
        # the original 0 / (B*(B-1))).  Closed form: no HBM pass.
        div = jnp.float32(0.0) if B > 1 else jnp.float32(float('nan'))
        total = total + diversity_weight * div
        components['diversity'] = div

    if latent_l1_weight > 0 or latent_l2_weight > 0:
        # Tiny reductions: left to XLA (a monolithic VMEM kernel buys nothing).
        lat32 = latent.astype(jnp.float32)
        if latent_l1_weight > 0:
            lat_l1 = jnp.mean(jnp.abs(lat32))
            total = total + latent_l1_weight * lat_l1
            components['latent_l1'] = lat_l1
        if latent_l2_weight > 0:
            lat_l2 = jnp.mean(lat32 * lat32)
            total = total + latent_l2_weight * lat_l2
            components['latent_l2'] = lat_l2

    components['total'] = total
    return total, components


# --------------------------------------------------------------------------- #
if __name__ == "__main__":
    key = jax.random.PRNGKey(0)
    kp, kt, kl = jax.random.split(key, 3)

    B, S, C, H, W, L = 2, 8, 3, 16, 16, 32
    pred = jax.random.normal(kp, (B, S, C, H, W), jnp.float32)
    target = jax.random.normal(kt, (B, S, C, H, W), jnp.float32)
    latent = jax.random.normal(kl, (B, S, L), jnp.float32)
    # deterministic valid mask: episode 0 full length, episode 1 half length
    lengths = jnp.array([S, S // 2])
    valid_mask = jnp.arange(S)[None, :] < lengths[:, None]

    total, comps = combined_loss(pred, valid_mask, target, latent)
    jax.block_until_ready(total)
    jax.block_until_ready(comps['total'])
    print("KERNEL_OK")
</pallas_src>

<mosaic_0001>
module attributes {stable_mosaic.version = 11 : i64} {
  func.func @_frame_loss_kernel(%arg0: i32, %arg1: memref<24x256xf32, #tpu.memory_space<vmem>>, %arg2: memref<24x256xf32, #tpu.memory_space<vmem>>, %arg3: memref<1x5x24xf32, #tpu.memory_space<vmem>>) attributes {dimension_semantics = [#tpu.dimension_semantics<parallel>], iteration_bounds = array<i64: 2>, scalar_prefetch = 0 : i64, scratch_operands = 0 : i64, tpu.core_type = #tpu.core_type<tc>, window_params = [{transform_indices = @transform_0, window_bounds = array<i64: 24, 256>}, {transform_indices = @transform_1, window_bounds = array<i64: 24, 256>}, {transform_indices = @transform_2, window_bounds = array<i64: 1, 5, 24>}]} {
    %c0 = arith.constant 0 : index
    %c0_0 = arith.constant 0 : index
    %0 = vector.load %arg1[%c0, %c0_0] : memref<24x256xf32, #tpu.memory_space<vmem>>, vector<24x256xf32>
    %c0_1 = arith.constant 0 : index
    %c0_2 = arith.constant 0 : index
    %1 = vector.load %arg2[%c0_1, %c0_2] : memref<24x256xf32, #tpu.memory_space<vmem>>, vector<24x256xf32>
    %2 = arith.subf %0, %1 : vector<24x256xf32>
    %3 = arith.mulf %2, %2 : vector<24x256xf32>
    %cst = arith.constant dense<0.000000e+00> : vector<24xf32>
    %4 = vector.multi_reduction <add>, %3, %cst [1] : vector<24x256xf32> to vector<24xf32>
    %5 = math.absf %2 : vector<24x256xf32>
    %cst_3 = arith.constant dense<0.000000e+00> : vector<24xf32>
    %6 = vector.multi_reduction <add>, %5, %cst_3 [1] : vector<24x256xf32> to vector<24xf32>
    %cst_4 = arith.constant dense<0.000000e+00> : vector<24xf32>
    %7 = vector.multi_reduction <add>, %1, %cst_4 [1] : vector<24x256xf32> to vector<24xf32>
    %8 = vector.shape_cast %7 : vector<24xf32> to vector<24x1xf32>
    %cst_5 = arith.constant 3.906250e-03 : f32
    %9 = vector.broadcast %cst_5 : f32 to vector<24x1xf32>
    %10 = arith.mulf %8, %9 : vector<24x1xf32>
    %11 = vector.broadcast %10 : vector<24x1xf32> to vector<24x256xf32>
    %12 = arith.subf %1, %11 : vector<24x256xf32>
    %13 = arith.mulf %12, %12 : vector<24x256xf32>
    %cst_6 = arith.constant dense<0.000000e+00> : vector<24xf32>
    %14 = vector.multi_reduction <add>, %13, %cst_6 [1] : vector<24x256xf32> to vector<24xf32>
    %cst_7 = arith.constant 0.00392156886 : f32
    %15 = vector.broadcast %cst_7 : f32 to vector<24xf32>
    %16 = arith.mulf %14, %15 : vector<24xf32>
    %17 = math.sqrt %16 : vector<24xf32>
    %18 = vector.shape_cast %10 : vector<24x1xf32> to vector<24xf32>
    %19 = tpu.concatenate %0, %1 in 0 : vector<24x256xf32>, vector<24x256xf32> -> vector<48x256xf32>
    %20 = tpu.iota {dimensions = array<i32: 1>} : vector<48x256xi32>
    %c16_i32 = arith.constant 16 : i32
    %c0_i32 = arith.constant 0 : i32
    %21 = arith.cmpi eq, %c16_i32, %c0_i32 : i32
    %c1_i32 = arith.constant 1 : i32
    %22 = arith.select %21, %c1_i32, %c16_i32 : i32
    %23 = vector.broadcast %22 : i32 to vector<48x256xi32>
    %24 = arith.remsi %20, %23 : vector<48x256xi32>
    %c0_i32_8 = arith.constant 0 : i32
    %25 = vector.broadcast %c0_i32_8 : i32 to vector<48x256xi32>
    %26 = arith.cmpi ne, %24, %25 : vector<48x256xi32>
    %c0_i32_9 = arith.constant 0 : i32
    %27 = vector.broadcast %c0_i32_9 : i32 to vector<48x256xi32>
    %28 = arith.cmpi slt, %24, %27 : vector<48x256xi32>
    %c0_i32_10 = arith.constant 0 : i32
    %29 = arith.cmpi slt, %22, %c0_i32_10 : i32
    %30 = vector.broadcast %29 : i1 to vector<48x256xi1>
    %31 = vector.broadcast %30 : vector<48x256xi1> to vector<48x256xi1>
    %32 = arith.xori %28, %31 : vector<48x256xi1>
    %33 = arith.andi %32, %26 : vector<48x256xi1>
    %34 = vector.broadcast %22 : i32 to vector<48x256xi32>
    %35 = arith.addi %24, %34 : vector<48x256xi32>
    %36 = arith.select %33, %35, %24 : vector<48x256xi1>, vector<48x256xi32>
    %c240_i32 = arith.constant 240 : i32
    %37 = vector.broadcast %c240_i32 : i32 to vector<48x256xi32>
    %38 = arith.cmpi slt, %20, %37 : vector<48x256xi32>
    %c16_i32_11 = arith.constant 16 : i32
    %39 = vector.broadcast %c16_i32_11 : i32 to vector<48x256xi32>
    %40 = arith.cmpi sge, %20, %39 : vector<48x256xi32>
    %c15_i32 = arith.constant 15 : i32
    %41 = vector.broadcast %c15_i32 : i32 to vector<48x256xi32>
    %42 = arith.cmpi slt, %36, %41 : vector<48x256xi32>
    %c1_i32_12 = arith.constant 1 : i32
    %43 = vector.broadcast %c1_i32_12 : i32 to vector<48x256xi32>
    %44 = arith.cmpi sge, %36, %43 : vector<48x256xi32>
    %c16_i32_13 = arith.constant 16 : i32
    %45 = tpu.dynamic_rotate %19 by %c16_i32_13 dim 1 : vector<48x256xf32>, i32 -> vector<48x256xf32>
    %cst_14 = arith.constant 0.000000e+00 : f32
    %46 = vector.broadcast %cst_14 : f32 to vector<48x256xf32>
    %47 = arith.select %40, %45, %46 : vector<48x256xi1>, vector<48x256xf32>
    %c240_i32_15 = arith.constant 240 : i32
    %48 = tpu.dynamic_rotate %19 by %c240_i32_15 dim 1 : vector<48x256xf32>, i32 -> vector<48x256xf32>
    %cst_16 = arith.constant 0.000000e+00 : f32
    %49 = vector.broadcast %cst_16 : f32 to vector<48x256xf32>
    %50 = arith.select %38, %48, %49 : vector<48x256xi1>, vector<48x256xf32>
    %cst_17 = arith.constant 2.000000e+00 : f32
    %51 = vector.broadcast %cst_17 : f32 to vector<48x256xf32>
    %52 = arith.mulf %51, %19 : vector<48x256xf32>
    %53 = arith.addf %47, %52 : vector<48x256xf32>
    %54 = arith.addf %53, %50 : vector<48x256xf32>
    %55 = arith.subf %50, %47 : vector<48x256xf32>
    %c255_i32 = arith.constant 255 : i32
    %56 = tpu.dynamic_rotate %54 by %c255_i32 dim 1 : vector<48x256xf32>, i32 -> vector<48x256xf32>
    %cst_18 = arith.constant 0.000000e+00 : f32
    %57 = vector.broadcast %cst_18 : f32 to vector<48x256xf32>
    %58 = arith.select %42, %56, %57 : vector<48x256xi1>, vector<48x256xf32>
    %c1_i32_19 = arith.constant 1 : i32
    %59 = tpu.dynamic_rotate %54 by %c1_i32_19 dim 1 : vector<48x256xf32>, i32 -> vector<48x256xf32>
    %cst_20 = arith.constant 0.000000e+00 : f32
    %60 = vector.broadcast %cst_20 : f32 to vector<48x256xf32>
    %61 = arith.select %44, %59, %60 : vector<48x256xi1>, vector<48x256xf32>
    %62 = arith.subf %58, %61 : vector<48x256xf32>
    %c1_i32_21 = arith.constant 1 : i32
    %63 = tpu.dynamic_rotate %55 by %c1_i32_21 dim 1 : vector<48x256xf32>, i32 -> vector<48x256xf32>
    %cst_22 = arith.constant 0.000000e+00 : f32
    %64 = vector.broadcast %cst_22 : f32 to vector<48x256xf32>
    %65 = arith.select %44, %63, %64 : vector<48x256xi1>, vector<48x256xf32>
    %cst_23 = arith.constant 2.000000e+00 : f32
    %66 = vector.broadcast %cst_23 : f32 to vector<48x256xf32>
    %67 = arith.mulf %66, %55 : vector<48x256xf32>
    %68 = arith.addf %65, %67 : vector<48x256xf32>
    %c255_i32_24 = arith.constant 255 : i32
    %69 = tpu.dynamic_rotate %55 by %c255_i32_24 dim 1 : vector<48x256xf32>, i32 -> vector<48x256xf32>
    %cst_25 = arith.constant 0.000000e+00 : f32
    %70 = vector.broadcast %cst_25 : f32 to vector<48x256xf32>
    %71 = arith.select %42, %69, %70 : vector<48x256xi1>, vector<48x256xf32>
    %72 = arith.addf %68, %71 : vector<48x256xf32>
    %73 = arith.mulf %62, %62 : vector<48x256xf32>
    %74 = arith.mulf %72, %72 : vector<48x256xf32>
    %75 = arith.addf %73, %74 : vector<48x256xf32>
    %cst_26 = arith.constant 9.99999997E-7 : f32
    %76 = vector.broadcast %cst_26 : f32 to vector<48x256xf32>
    %77 = arith.addf %75, %76 : vector<48x256xf32>
    %78 = math.sqrt %77 : vector<48x256xf32>
    %79 = vector.extract_strided_slice %78 {offsets = [0, 0], sizes = [24, 256], strides = [1, 1]} : vector<48x256xf32> to vector<24x256xf32>
    %80 = vector.extract_strided_slice %78 {offsets = [24, 0], sizes = [24, 256], strides = [1, 1]} : vector<48x256xf32> to vector<24x256xf32>
    %81 = arith.subf %79, %80 : vector<24x256xf32>
    %82 = arith.mulf %81, %81 : vector<24x256xf32>
    %cst_27 = arith.constant dense<0.000000e+00> : vector<24xf32>
    %83 = vector.multi_reduction <add>, %82, %cst_27 [1] : vector<24x256xf32> to vector<24xf32>
    %84 = vector.shape_cast %4 : vector<24xf32> to vector<1x24xf32>
    %85 = vector.shape_cast %6 : vector<24xf32> to vector<1x24xf32>
    %86 = vector.shape_cast %18 : vector<24xf32> to vector<1x24xf32>
    %87 = vector.shape_cast %17 : vector<24xf32> to vector<1x24xf32>
    %88 = vector.shape_cast %83 : vector<24xf32> to vector<1x24xf32>
    %89 = tpu.concatenate %84, %85, %86, %87, %88 in 0 : vector<1x24xf32>, vector<1x24xf32>, vector<1x24xf32>, vector<1x24xf32>, vector<1x24xf32> -> vector<5x24xf32>
    %c0_28 = arith.constant 0 : index
    %c0_29 = arith.constant 0 : index
    %c0_30 = arith.constant 0 : index
    %90 = vector.load %arg3[%c0_28, %c0_29, %c0_30] : memref<1x5x24xf32, #tpu.memory_space<vmem>>, vector<1x5x24xf32>
    %91 = vector.shape_cast %90 : vector<1x5x24xf32> to vector<5x24xf32>
    %92 = vector.shape_cast %89 : vector<5x24xf32> to vector<1x5x24xf32>
    tpu.vector_store %arg3[%c0_28, %c0_29, %c0_30], %92 {strides = array<i32>} : memref<1x5x24xf32, #tpu.memory_space<vmem>>, vector<1x5x24xf32>,
    return
  }
  func.func @transform_0(%arg0: i32) -> (i32, i32) {
    %c0_i32 = arith.constant 0 : i32
    %c0_i32_0 = arith.constant 0 : i32
    return %arg0, %c0_i32 : i32, i32
  }
  func.func @transform_1(%arg0: i32) -> (i32, i32) {
    %c0_i32 = arith.constant 0 : i32
    %c0_i32_0 = arith.constant 0 : i32
    return %arg0, %c0_i32 : i32, i32
  }
  func.func @transform_2(%arg0: i32) -> (i32, i32, i32) {
    %c0_i32 = arith.constant 0 : i32
    %c0_i32_0 = arith.constant 0 : i32
    %c0_i32_1 = arith.constant 0 : i32
    return %arg0, %c0_i32, %c0_i32_0 : i32, i32, i32
  }
}

</mosaic_0001>

<bundles_post_ra>
// kernel: tpu_custom_call.1
= control target key start
LH: loop header
LB: loop body
LE: loop exit
PB: predicated region body
PF: predicated region fallthrough
CT: control target
= control target key end

     0   :  { %7 = vsyncpa [#allocation3], 0  ;;  %s2306_s0 = inlined_call_operand.hbm [shape: f32[48,256], index: 0, kind: input, shape index: {}]   ;;  %s2307_s1 = inlined_call_operand.hbm [shape: f32[48,256], index: 1, kind: input, shape index: {}]   ;;  %s2308_s2 = inlined_call_operand.vmem [shape: f32[2,5,24], index: 2, kind: output, shape index: {}]  }
   0x1   :  { %9 = vsyncpa [#allocation3 + $0x1], 0 }
   0x2   :  { %10 = vsyncpa [#allocation5], 0 }
   0x3   :  { %12 = vsyncpa [#allocation5 + $0x1], 0  ;;  %s1298_s9 = smov 0   ;;  %s1300_s10 = smov 0  }
   0x4   :  { %s1302_s11 = smov 0   ;;  %s1304_s12 = smov 0  }
   0x5 LB: > { %s1317_s13 = sadd.s32 4294967295, %s1273_s12   ;;  %s1320_s14 = sadd.s32 1, %s1273_s12   ;;  %s1273_s12 = sphi %s1304_s12, %s2326_s12   ;;  %s1269_s11 = sphi %s1302_s11, %s2325_s11   ;;  %s1265_s10 = sphi %s1300_s10, %s2324_s10   ;;  %s1261_s9 = sphi %s1298_s9, %s2323_s9  }
   0x6   : > { %s22_s15 = ssub.s32 %s1273_s12, %s1320_s14  ;;  %s25_s16 = sadd.s32 1, %s1269_s11 }
   0x7   : > { %p23_p0 = scmp.eq.s32.totalorder %s22_s15, 0  ;;  %p32_p1 = scmp.ne.s32.totalorder %s1269_s11, %s1265_s10 }
   0x8   : > { %p33_p2 = scmp.eq.s32.totalorder %s1273_s12, 0  ;;  %p38_p3 = scmp.ne.s32.totalorder %s1265_s10, %s1261_s9 }
   0x9   : > { %s1330_s17 = scalar_select %p23_p0, %s1269_s11, %s25_s16  }
   0xa   : > { %p34_p4 = por %p33_p2, %p32_p1  ;;  %p39_p5 = scmp.eq.s32.totalorder %s1317_s13, 0 }
   0xb   : > { %p1110_p6 = scmp.lt.s32.totalorder %s1273_s12, 2  ;;  %s1339_s19 = sand.u32 1, %s1269_s11  }
   0xc   : > { %p1334_p7 = por %p39_p5, %p38_p3  ;;  %s1096_s20 = smul.u32 48, %s1339_s19 }
   0xd   : > { %s1094_s21 = smul.u32 768, %s1273_s12  ;;  %p1343_p8 = pnand %p1110_p6, %p34_p4 }
   0xe   : > { %s2310_s18 = scalar_select %p1334_p7, 1, 0 }
   0xf   : > { %s1352_s25 = scalar_lea.hbm %s2306_s0, %s1094_s21  ;;  %s118_s26 = scalar_lea.vmem [#allocation2], %s1096_s20 }
  0x10   : > { %s126_s27 = sshll.u32 %s118_s26, 4  ;;  %s115_s28 = scalar_lea.sflag [#allocation3], %s1339_s19  ;;  %s1356_s27 = int_to_ptr.vmem [resolvable:$true] %s126_s27 }
  0x11   : > { %s1179_s29 = scalar_lea.hbm %s1352_s25, 768  ;;  %p1181_p11 = pneg %p1343_p8 }
  0x12   : > { %p1180_p10 = scmp.ne.s32.totalorder %s1352_s25, %s1179_s29  ;;  %s1184_s4 = scalar_lea.hbm %s2306_s0, 1536 }
  0x13   : > { %p1185_p0 = scmp.lt.s32.totalorder %s1352_s25, %s2306_s0  ;;  %p1186_p1 = scmp.lt.s32.totalorder %s1184_s4, %s1179_s29 }
  0x14   : > { %p1182_p12 = pnand %p1181_p11, %p1180_p10 }
  0x15   : > { %p1187_p2 = por %p1186_p1, %p1185_p0 }
  0x16   : > { %p1183_p13 = pneg %p1182_p12 }
  0x18   : > { %p1188_p3 = pnand %p1187_p2, %p1183_p13 }
  0x1a   : > { %1191 = shalt.err (!%p1188_p3)
}
  0x1b   : > { %s1192_s7 = scalar_lea.vmem %s1356_s27, 768  ;;  %s1275_s8 = smov [#allocation2]  }
  0x1c   : > { %p1193_p4 = scmp.ne.s32.totalorder %s1356_s27, %s1192_s7  ;;  %s1197_s9 = sshll.u32 %s1275_s8, 4  ;;  %s1198_s9 = int_to_ptr.vmem [resolvable:$false] %s1197_s9 }
  0x1d   : > { %s1199_s15 = scalar_lea.vmem %s1198_s9, 1536  ;;  %p1200_p10 = scmp.lt.s32.totalorder %s1356_s27, %s1198_s9 }
  0x1e   : > { %p1195_p5 = pnand %p1193_p4, %p1181_p11  ;;  %p1201_p12 = scmp.lt.s32.totalorder %s1199_s15, %s1192_s7 }
  0x20   : > { %p1196_p6 = pneg %p1195_p5  ;;  %p1202_p9 = por %p1201_p12, %p1200_p10 }
  0x22   : > { %p1203_p0 = pnand %p1202_p9, %p1196_p6 }
  0x24   : > { %1206 = shalt.err (!%p1203_p0)
}
  0x25   : > { %s1276_s16 = smov 256   ;;  %s1277_s23 = smov 16  }
  0x26   : > { %1106 = dma.hbm_to_vmem [thread:$0]  (!%p1343_p8), %s1352_s25, 768, %s1356_s27, %s115_s28, %s1276_s16, %s1276_s16, %s1277_s23  }
  0x27   : > { %p156_p9 = scmp.lt.s32.totalorder %s1273_s12, 3  ;;  %s1395_s29 = scalar_lea.hbm %s2307_s1, %s1094_s21 }
  0x28   : > { %p2312_p13 = scmp.ge.s32.totalorder %s1273_s12, 1  ;;  %s140_s3 = scalar_lea.vmem [#allocation4], %s1096_s20 }
  0x29   : > { %s148_s4 = sshll.u32 %s140_s3, 4  ;;  %s137_s25 = scalar_lea.sflag [#allocation5], %s1339_s19  ;;  %s1405_s4 = int_to_ptr.vmem [resolvable:$true] %s148_s4 }
  0x2a   : > { %p1399_p1 = pnand %p2312_p13, %p156_p9  ;;  %s1207_s27 = scalar_lea.hbm %s1395_s29, 768 }
  0x2b   : > { %p1208_p2 = scmp.ne.s32.totalorder %s1395_s29, %s1207_s27  ;;  %s1212_s28 = scalar_lea.hbm %s2307_s1, 1536 }
  0x2c   : > { %p1213_p5 = scmp.lt.s32.totalorder %s1395_s29, %s2307_s1  ;;  %p1214_p6 = scmp.lt.s32.totalorder %s1212_s28, %s1207_s27 }
  0x2d   : > { %p1210_p3 = pnand %p1208_p2, %p1181_p11 }
  0x2e   : > { %p1215_p10 = por %p1214_p6, %p1213_p5 }
  0x2f   : > { %p1211_p4 = pneg %p1210_p3 }
  0x31   : > { %p1216_p12 = pnand %p1215_p10, %p1211_p4 }
  0x33   : > { %1219 = shalt.err (!%p1216_p12)
}
  0x34   : > { %s1220_s19 = scalar_lea.vmem %s1405_s4, 768  ;;  %s1278_s20 = smov [#allocation4]  }
  0x35   : > { %p1221_p0 = scmp.ne.s32.totalorder %s1405_s4, %s1220_s19  ;;  %s1225_s7 = sshll.u32 %s1278_s20, 4  ;;  %s1226_s7 = int_to_ptr.vmem [resolvable:$false] %s1225_s7 }
  0x36   : > { %s1227_s8 = scalar_lea.vmem %s1226_s7, 1536  ;;  %p1228_p2 = scmp.lt.s32.totalorder %s1405_s4, %s1226_s7 }
  0x37   : > { %p1223_p9 = pnand %p1221_p0, %p1181_p11  ;;  %p1229_p3 = scmp.lt.s32.totalorder %s1227_s8, %s1220_s19 }
  0x39   : > { %p1224_p13 = pneg %p1223_p9  ;;  %p1230_p7 = por %p1229_p3, %p1228_p2 }
  0x3b   : > { %p1231_p5 = pnand %p1230_p7, %p1224_p13 }
  0x3d   : > { %1234 = shalt.err (!%p1231_p5)
}
  0x3e   : > { %1109 = dma.hbm_to_vmem [thread:$0]  (!%p1343_p8), %s1395_s29, 768, %s1405_s4, %s137_s25, %s1276_s16, %s1276_s16, %s1277_s23  }
  0x3f   : > { %160 = sbr.rel (%p1399_p1) target bundleno = 605 (0x25d), region = 28  ;;  %s162_s9 = sand.u32 (!%p1399_p1), 1, %s1265_s10  }
  0x40   : > { %s1098_s15 = smul.u32 (!%p1399_p1), 48, %s162_s9  ;;  %s163_s24 = scalar_lea.sflag (!%p1399_p1), [#allocation3], %s162_s9 }
  0x41   : > { %p2314_p7 = scmp.ne.s32.totalorder (!%p1399_p1), %s2310_s18, 0 }
  0x42   : > { %s1436_s26 = scalar_lea.vmem (!%p1399_p1), [#allocation2], %s1098_s15 }
  0x44   : > { %1252 = dma.done.wait (%p2314_p7), %s163_s24, 768  }
  0x45   : > { %1254 = vsyncadd (%p2314_p7), %s163_s24, 4294966528  ;;  %s172_s22 = scalar_lea.sflag [#allocation5], %s162_s9  ;;  %s1442_s3 = scalar_lea.vmem [#allocation4], %s1098_s15 }
  0x46   : > { %1256 = dma.done.wait (%p2314_p7), %s172_s22, 768  }
  0x47   : > { %1258 = vsyncadd (%p2314_p7), %s172_s22, 4294966528  ;;  %v1449_v0 = vld [vmem:[%s1442_s3] sm:$0xff]  ;;  %s1279_s16 = smov 16   ;;  %v1459_v2 = vld [vmem:[%s1442_s3 + $0x10] sm:$0xff]  ;;  %s1280_s18 = smov 112   ;;  %v311_v21 = vlaneseq  ;;  %vm899_vm4 = vcmask 130112  }
  0x48   : > { %v1452_v1 = vld [vmem:[%s1436_s26] sm:$0xff]  ;;  %352 = vrot.lane.b32.xlu1 %v1449_v0, %s1279_s16  ;;  %v1462_v3 = vld [vmem:[%s1436_s26 + $0x10] sm:$0xff]  ;;  %v1469_v4 = vld [vmem:[%s1436_s26 + $0x18] sm:$0xff]  ;;  %s1281_s23 = smov 1   ;;  %s1282_s29 = smov 127   ;;  %vm906_vm5 = vcmask 195712  }
  0x49   : > { %346 = vrot.lane.b32.xlu0 %v1452_v1, %s1279_s16  ;;  %v1472_v5 = vld [vmem:[%s1436_s26 + $0x8] sm:$0xff]  ;;  %v1479_v6 = vld [vmem:[%s1442_s3 + $0x18] sm:$0xff]  ;;  %v1497_v8 = vld [vmem:[%s1442_s3 + $0x20] sm:$0xff]  ;;  %v1529_v24 = vand.u32 127, %v311_v21  ;;  %p202_p8 = scmp.lt.s32.totalorder %s1317_s13, 1 }
  0x4a   : > { %v1482_v7 = vld [vmem:[%s1442_s3 + $0x8] sm:$0xff]  ;;  %v1500_v9 = vld [vmem:[%s1436_s26 + $0x20] sm:$0xff]  ;;  %v257_v14 = vadd.f32 %v1479_v6, %v1459_v2 }
  0x4b   : > { %v1507_v10 = vld [vmem:[%s1442_s3 + $0x28] sm:$0xff]  ;;  %v254_v12 = vadd.f32 %v1482_v7, %v1449_v0  ;;  %vm370_vm0 = vcmp.lt.s32.totalorder %v1529_v24, 16  ;;  %vm340_vm1 = vcmp.ge.s32.totalorder %v1529_v24, 16  ;;  %vm419_vm2 = vcmp.lt.s32.totalorder %v1529_v24, 112  ;;  %s2328_s13 = smov (!%p202_p8, %s1317_s13), 1 }
  0x4c   : > { %354 = vrot.lane.b32.xlu1 %v1459_v2, %s1279_s16  ;;  %v1510_v11 = vld [vmem:[%s1436_s26 + $0x28] sm:$0xff]  ;;  %v260_v13 = vadd.f32 %v1507_v10, %v1497_v8  ;;  %v1553_v37 = vadd.s32 128, %v1529_v24  ;;  %vm565_vm8 = vcmp.lt.s32.totalorder %v1529_v24, 1  ;;  %vm516_vm9 = vcmp.lt.s32.totalorder %v1529_v24, 127  ;;  %s1087_s30 = sshll.u32 %s2328_s13, 3 }
  0x4d   : > { %348 = vrot.lane.b32.xlu0 %v1462_v3, %s1279_s16  ;;  %s205_s27 = scalar_lea.vmem %s2308_s2, %s1087_s30 }
  0x4e   : > { %vm339_vm3 = vcmp.lt.s32.totalorder %v1553_v37, 240 }
  0x50   : > { %360 = vrot.lane.b32.xlu1 %v1469_v4, %s1279_s16 }
  0x51   : > { %358 = vrot.lane.b32.xlu0 %v1472_v5, %s1279_s16 }
  0x54   : > { %366 = vrot.lane.b32.xlu1 %v1479_v6, %s1279_s16 }
  0x55   : > { %364 = vrot.lane.b32.xlu0 %v1482_v7, %s1279_s16 }
  0x58   : > { %397 = vrot.lane.b32.xlu1 %v1462_v3, %s1280_s18 }
  0x59   : > { %395 = vrot.lane.b32.xlu0 %v1452_v1, %s1280_s18 }
  0x5c   : > { %403 = vrot.lane.b32.xlu1 %v1459_v2, %s1280_s18 }
  0x5d   : > { %401 = vrot.lane.b32.xlu0 %v1449_v0, %s1280_s18 }
  0x60   : > { %409 = vrot.lane.b32.xlu1 %v1469_v4, %s1280_s18 }
  0x61   : > { %407 = vrot.lane.b32.xlu0 %v1472_v5, %s1280_s18 }
  0x64   : > { %415 = vrot.lane.b32.xlu1 %v1479_v6, %s1280_s18 }
  0x65   : > { %413 = vrot.lane.b32.xlu0 %v1482_v7, %s1280_s18 }
  0x68   : > { %356 = vrot.lane.b32.xlu1 %v1497_v8, %s1279_s16 }
  0x69   : > { %350 = vrot.lane.b32.xlu0 %v1500_v9, %s1279_s16 }
  0x6c   : > { %368 = vrot.lane.b32.xlu1 %v1507_v10, %s1279_s16 }
  0x6d   : > { %362 = vrot.lane.b32.xlu0 %v1510_v11, %s1279_s16 }
  0x70   : > { %405 = vrot.lane.b32.xlu1 %v1497_v8, %s1280_s18 }
  0x71   : > { %399 = vrot.lane.b32.xlu0 %v1500_v9, %s1280_s18 }
  0x74   : > { %417 = vrot.lane.b32.xlu1 %v1507_v10, %s1280_s18 }
  0x75   : > { %411 = vrot.lane.b32.xlu0 %v1510_v11, %s1280_s18 }
  0x94   : > { %255 = vadd.xlane.f32.xlu0 %v254_v12 }
  0x98   : > { %261 = vadd.xlane.f32.xlu0 %v260_v13  ;;  %258 = vadd.xlane.f32.xlu1 %v257_v14 }
  0xba   : > { %v1526_v15 = vpop.permute.xlu1 %352 }
  0xbb   : > { %v347_v16 = vpop.permute.xlu0 %346 }
  0xbe   : > { %v355_v17 = vpop.permute.xlu1 %354 }
  0xbf   : > { %v349_v18 = vpop.permute.xlu0 %348 }
  0xc2   : > { %v361_v19 = vpop.permute.xlu1 %360 }
  0xc3   : > { %v359_v20 = vpop.permute.xlu0 %358  ;;  %v378_v29 = vsel %vm370_vm0, %v361_v19, %v349_v18  ;;  %v372_v58 = vsel %vm370_vm0, %v349_v18, %v361_v19 }
  0xc4   : > { %v377_v30 = vsel %vm370_vm0, %v359_v20, %v347_v16  ;;  %v1540_v33 = vsel %vm340_vm1, %v378_v29, 0.0  ;;  %v371_v59 = vsel %vm370_vm0, %v347_v16, %v359_v20 }
  0xc5   : > { %v1561_v39 = vsel %vm340_vm1, %v377_v30, 0.0 }
  0xc6   : > { %v367_v22 = vpop.permute.xlu1 %366 }
  0xc7   : > { %v365_v23 = vpop.permute.xlu0 %364  ;;  %v381_v36 = vsel %vm370_vm0, %v367_v22, %v355_v17  ;;  %v375_v14 = vsel %vm370_vm0, %v355_v17, %v367_v22 }
  0xc8   : > { %v380_v40 = vsel %vm370_vm0, %v365_v23, %v1526_v15  ;;  %v1574_v44 = vsel %vm340_vm1, %v381_v36, 0.0  ;;  %v374_v16 = vsel %vm370_vm0, %v1526_v15, %v365_v23 }
  0xc9   : > { %v1597_v50 = vsel %vm340_vm1, %v380_v40, 0.0  ;;  %v446_v40 = vmul.f32 2.0, %v1462_v3 }
  0xca   : > { %v398_v25 = vpop.permute.xlu1 %397 }
  0xcb   : > { %v396_v26 = vpop.permute.xlu0 %395 }
  0xce   : > { %v404_v27 = vpop.permute.xlu1 %403 }
  0xcf   : > { %v402_v28 = vpop.permute.xlu0 %401 }
  0xd2   : > { %v410_v31 = vpop.permute.xlu1 %409 }
  0xd3   : > { %v408_v32 = vpop.permute.xlu0 %407  ;;  %v1544_v34 = vsel %vm419_vm2, %v398_v25, %v410_v31  ;;  %v427_v47 = vsel %vm419_vm2, %v410_v31, %v398_v25 }
  0xd4   : > { %v1548_v35 = vsel %vm419_vm2, %v396_v26, %v408_v32  ;;  %v1557_v38 = vsub.f32 %v1544_v34, %v1540_v33  ;;  %v426_v48 = vsel %vm419_vm2, %v408_v32, %v396_v26  ;;  %v1605_v54 = vsel %vm339_vm3, %v427_v47, 0.0 }
  0xd5   : > { %v1568_v41 = vsub.f32 %v1548_v35, %v1561_v39  ;;  %v433_v55 = vsel %vm339_vm3, %v426_v48, 0.0  ;;  %v1622_v60 = vsub.f32 %v1605_v54, %v372_v58  ;;  %v445_v48 = vmul.f32 2.0, %v1472_v5 }
  0xd6   : > { %v416_v42 = vpop.permute.xlu1 %415  ;;  %604 = vrot.lane.b32.xlu1 %v1557_v38, %s1281_s23  ;;  %v1624_v61 = vsub.f32 %v433_v55, %v371_v59 }
  0xd7   : > { %v414_v43 = vpop.permute.xlu0 %413  ;;  %v1578_v45 = vsel %vm419_vm2, %v404_v27, %v416_v42  ;;  %602 = vrot.lane.b32.xlu0 %v1568_v41, %s1281_s23  ;;  %v430_v56 = vsel %vm419_vm2, %v416_v42, %v404_v27 }
  0xd8   : > { %v1582_v46 = vsel %vm419_vm2, %v402_v28, %v414_v43  ;;  %v1591_v49 = vsub.f32 %v1578_v45, %v1574_v44  ;;  %v429_v57 = vsel %vm419_vm2, %v414_v43, %v402_v28  ;;  %v441_v12 = vsel %vm339_vm3, %v430_v56, 0.0 }
  0xd9   : > { %v1601_v51 = vsub.f32 %v1582_v46, %v1597_v50  ;;  %v1630_v13 = vsel %vm339_vm3, %v429_v57, 0.0  ;;  %v1641_v18 = vsub.f32 %v441_v12, %v375_v14 }
  0xda   : > { %v357_v52 = vpop.permute.xlu1 %356  ;;  %v1644_v19 = vsub.f32 %v1630_v13, %v374_v16 }
  0xdb   : > { %v351_v53 = vpop.permute.xlu0 %350  ;;  %610 = vrot.lane.b32.xlu0 %v1591_v49, %s1281_s23  ;;  %608 = vrot.lane.b32.xlu1 %v1601_v51, %s1281_s23 }
  0xde   : > { %v369_v62 = vpop.permute.xlu1 %368 }
  0xdf   : > { %v363_v63 = vpop.permute.xlu0 %362  ;;  %616 = vrot.lane.b32.xlu0 %v1622_v60, %s1281_s23  ;;  %614 = vrot.lane.b32.xlu1 %v1624_v61, %s1281_s23  ;;  %v382_v26 = vsel %vm370_vm0, %v369_v62, %v357_v52  ;;  %v1691_v43 = vsel %vm370_vm0, %v357_v52, %v369_v62  ;;  %v458_v52 = vadd.f32 %v446_v40, %v1540_v33  ;;  %v452_v62 = vmul.f32 2.0, %v1459_v2 }
  0xe0   : > { %v379_v17 = vsel %vm370_vm0, %v363_v63, %v351_v53  ;;  %v1656_v23 = vsel %vm340_vm1, %v382_v26, 0.0  ;;  %v1706_v57 = vsel %vm370_vm0, %v351_v53, %v363_v63  ;;  %v457_v26 = vadd.f32 %v445_v48, %v371_v59 }
  0xe1   : > { %v1676_v32 = vsel %vm340_vm1, %v379_v17, 0.0  ;;  %v470_v17 = vadd.f32 %v458_v52, %v1544_v34  ;;  %v447_v53 = vmul.f32 2.0, %v1469_v4  ;;  %v464_v33 = vadd.f32 %v452_v62, %v1574_v44 }
  0xe2   : > { %v406_v20 = vpop.permute.xlu1 %405  ;;  %v469_v63 = vadd.f32 %v457_v26, %v433_v55  ;;  %v453_v59 = vmul.f32 2.0, %v1479_v6  ;;  %v451_v44 = vmul.f32 2.0, %v1482_v7  ;;  %v449_v26 = vmul.f32 2.0, %v1510_v11 }
  0xe3   : > { %v400_v25 = vpop.permute.xlu0 %399  ;;  %622 = vrot.lane.b32.xlu0 %v1641_v18, %s1281_s23  ;;  %620 = vrot.lane.b32.xlu1 %v1644_v19, %s1281_s23  ;;  %v459_v34 = vadd.f32 %v447_v53, %v372_v58 }
  0xe4   : > { %v463_v58 = vadd.f32 %v451_v44, %v374_v16  ;;  %v455_v16 = vmul.f32 2.0, %v1507_v10 }
  0xe5   : > { %v471_v40 = vadd.f32 %v459_v34, %v1605_v54  ;;  %v901_v54 = vadd.s32 4294967280, %v1529_v24 }
  0xe6   : > { %v418_v15 = vpop.permute.xlu1 %417 }
  0xe7   : > { %v412_v22 = vpop.permute.xlu0 %411  ;;  %v1660_v27 = vsel %vm419_vm2, %v406_v20, %v418_v15  ;;  %v431_v28 = vsel %vm419_vm2, %v418_v15, %v406_v20 }
  0xe8   : > { %v1666_v29 = vsel %vm419_vm2, %v400_v25, %v412_v22  ;;  %v1670_v30 = vsub.f32 %v1660_v27, %v1656_v23  ;;  %v428_v31 = vsel %vm419_vm2, %v412_v22, %v400_v25  ;;  %v1680_v36 = vsel %vm339_vm3, %v431_v28, 0.0 }
  0xe9   : > { %v1685_v42 = vsub.f32 %v1666_v29, %v1676_v32  ;;  %v1695_v47 = vsel %vm339_vm3, %v428_v31, 0.0  ;;  %v1700_v56 = vsub.f32 %v1680_v36, %v1691_v43  ;;  %v444_v25 = vmul.f32 2.0, %v1452_v1 }
  0xea   : > { %612 = vrot.lane.b32.xlu0 %v1670_v30, %s1281_s23  ;;  %v1712_v20 = vsub.f32 %v1695_v47, %v1706_v57  ;;  %v450_v22 = vmul.f32 2.0, %v1449_v0  ;;  %v476_v28 = vadd.f32 %v464_v33, %v1578_v45 }
  0xeb   : > { %606 = vrot.lane.b32.xlu1 %v1685_v42, %s1281_s23  ;;  %v456_v15 = vadd.f32 %v444_v25, %v1561_v39  ;;  %v465_v39 = vadd.f32 %v453_v59, %v375_v14  ;;  %v894_v14 = vadd.s32 4294967288, %v1529_v24  ;;  %v461_v59 = vadd.f32 %v449_v26, %v1706_v57 }
  0xec   : > { %v462_v55 = vadd.f32 %v450_v22, %v1597_v50  ;;  %v891_v50 = vshrl.u32 %v311_v21, 7  ;;  %v467_v22 = vadd.f32 %v455_v16, %v1691_v43  ;;  %v1818_v57 = vsub.f32 %v1469_v4, %v1479_v6 }
  0xed   : > { %v468_v31 = vadd.f32 %v456_v15, %v1548_v35  ;;  %v477_v48 = vadd.f32 %v465_v39, %v441_v12  ;;  %v475_v35 = vadd.f32 %v463_v58, %v1630_v13  ;;  %v448_v12 = vmul.f32 2.0, %v1500_v9 }
  0xee   : > { %624 = vrot.lane.b32.xlu0 %v1700_v56, %s1281_s23  ;;  %v474_v45 = vadd.f32 %v462_v55, %v1582_v46  ;;  %v454_v46 = vmul.f32 2.0, %v1497_v8  ;;  %v1770_v62 = vsub.s32 %v1529_v24, %v891_v50  ;;  %v1774_v25 = vsub.s32 %v901_v54, %v891_v50 }
  0xef   : > { %618 = vrot.lane.b32.xlu1 %v1712_v20, %s1281_s23  ;;  %v325_v58 = vand.u32 15, %v1553_v37  ;;  %v1834_v4 = vsub.f32 %v1472_v5, %v1482_v7  ;;  %v652_v5 = vmul.f32 2.0, %v1557_v38  ;;  %v650_v16 = vmul.f32 2.0, %v1568_v41 }
  0xf0   : > { %v466_v52 = vadd.f32 %v454_v46, %v1656_v23  ;;  %v1781_v23 = vsub.s32 %v894_v14, %v891_v50  ;;  %v1830_v46 = vsub.f32 %v1452_v1, %v1449_v0  ;;  %v656_v26 = vmul.f32 2.0, %v1601_v51 }
  0xf1   : > { %vm1840_vm6 = vcmp.ge.s32.totalorder %v325_v58, 1  ;;  %vm1948_vm10 = vcmp.lt.s32.totalorder %v325_v58, 15  ;;  %v1976_v58 = vmul.f32 2.0, %v1712_v20 }
  0xf2   : > { %494 = vrot.lane.b32.xlu0 %v470_v17, %s1282_s29  ;;  %v478_v53 = vadd.f32 %v466_v52, %v1660_v27  ;;  %v653_v52 = vmul.f32 2.0, %v1622_v60 }
  0xf3   : > { %504 = vrot.lane.b32.xlu1 %v469_v63, %s1282_s29 }
  0xf6   : > { %500 = vrot.lane.b32.xlu0 %v476_v28, %s1282_s29 }
  0xf7   : > { %492 = vrot.lane.b32.xlu1 %v468_v31, %s1282_s29 }
  0xfa   : > { %506 = vrot.lane.b32.xlu0 %v471_v40, %s1282_s29 }
  0xfb   : > { %498 = vrot.lane.b32.xlu1 %v474_v45, %s1282_s29 }
  0xfe   : > { %512 = vrot.lane.b32.xlu0 %v477_v48, %s1282_s29 }
  0xff   : > { %510 = vrot.lane.b32.xlu1 %v475_v35, %s1282_s29 }
 0x102   : > { %543 = vrot.lane.b32.xlu0 %v470_v17, %s1281_s23  ;;  %v460_v17 = vadd.f32 %v448_v12, %v1676_v32 }
 0x103   : > { %541 = vrot.lane.b32.xlu1 %v468_v31, %s1281_s23  ;;  %v479_v31 = vadd.f32 %v467_v22, %v1680_v36 }
 0x106   : > { %549 = vrot.lane.b32.xlu0 %v476_v28, %s1281_s23  ;;  %v472_v28 = vadd.f32 %v460_v17, %v1666_v29  ;;  %v473_v29 = vadd.f32 %v461_v59, %v1695_v47  ;;  %v1814_v47 = vsub.f32 %v1462_v3, %v1459_v2  ;;  %v227_v3 = vmul.f32 %v1818_v57, %v1818_v57 }
 0x107   : > { %547 = vrot.lane.b32.xlu1 %v474_v45, %s1281_s23  ;;  %v658_v17 = vmul.f32 2.0, %v1591_v49 }
 0x10a   : > { %555 = vrot.lane.b32.xlu0 %v471_v40, %s1281_s23 }
 0x10b   : > { %553 = vrot.lane.b32.xlu1 %v469_v63, %s1281_s23 }
 0x10e   : > { %561 = vrot.lane.b32.xlu0 %v477_v48, %s1281_s23  ;;  %v318_v48 = vand.u32 15, %v1529_v24 }
 0x10f   : > { %559 = vrot.lane.b32.xlu1 %v475_v35, %s1281_s23  ;;  %v226_v35 = vmul.f32 %v1814_v47, %v1814_v47 }
 0x110   : > { %vm1846_vm7 = vcmp.ge.s32.totalorder %v318_v48, 1  ;;  %vm1963_vm11 = vcmp.lt.s32.totalorder %v318_v48, 15  ;;  %v1979_v48 = vmul.f32 2.0, %v1685_v42 }
 0x112   : > { %676 = vrot.lane.b32.xlu0 %v1557_v38, %s1282_s29 }
 0x113   : > { %674 = vrot.lane.b32.xlu1 %v1568_v41, %s1282_s29 }
 0x116   : > { %682 = vrot.lane.b32.xlu0 %v1591_v49, %s1282_s29 }
 0x117   : > { %680 = vrot.lane.b32.xlu1 %v1601_v51, %s1282_s29 }
 0x11a   : > { %688 = vrot.lane.b32.xlu0 %v1622_v60, %s1282_s29 }
 0x11b   : > { %686 = vrot.lane.b32.xlu1 %v1624_v61, %s1282_s29 }
 0x11d   : > { %v256_v13 = vpop.xlane.xlu0 %255 }
 0x11e   : > { %694 = vrot.lane.b32.xlu0 %v1641_v18, %s1282_s29  ;;  %v1772_v21 = vmul.f32 0.00390625, %v256_v13 }
 0x11f   : > { %692 = vrot.lane.b32.xlu1 %v1644_v19, %s1282_s29 }
 0x120   : > { %v933_v34 = vrot.slane %v1772_v21, %v1770_v62  ;;  %v267_v51 = vsub.f32 %v1482_v7, %v1772_v21 }
 0x121   : > { %v262_v33 = vpop.xlane.xlu0 %261  ;;  %v259_v63 = vpop.xlane.xlu1 %258 }
 0x122   : > { %v265_v15 = vmul.f32 0.00390625, %v262_v33  ;;  %502 = vrot.lane.b32.xlu0 %v478_v53, %s1282_s29  ;;  %v264_v32 = vmul.f32 0.00390625, %v259_v63  ;;  %v233_v33 = vadd.f32 %v227_v3, %v226_v35  ;;  %v224_v63 = vmul.f32 %v1830_v46, %v1830_v46 }
 0x123   : > { %496 = vrot.lane.b32.xlu1 %v472_v28, %s1282_s29  ;;  %v273_v35 = vmul.f32 %v267_v51, %v267_v51  ;;  %v242_v3 = vand.u32 2147483647, %v1818_v57 }
 0x124   : > { %v942_v27 = vrot.slane %v265_v15, %v1774_v25  ;;  %v937_v44 = vrot.slane %v264_v32, %v1781_v23  ;;  %v268_v39 = vsub.f32 %v1459_v2, %v264_v32  ;;  %v269_v45 = vsub.f32 %v1479_v6, %v264_v32 }
 0x125   : > { %v270_v12 = vsub.f32 %v1497_v8, %v265_v15  ;;  %v271_v13 = vsub.f32 %v1507_v10, %v265_v15  ;;  %v225_v15 = vmul.f32 %v1834_v4, %v1834_v4 }
 0x126   : > { %514 = vrot.lane.b32.xlu0 %v479_v31, %s1282_s29  ;;  %v938_v43 = vsel %vm899_vm4, %v937_v44, %v933_v34  ;;  %v274_v50 = vmul.f32 %v268_v39, %v268_v39  ;;  %v275_v54 = vmul.f32 %v269_v45, %v269_v45 }
 0x127   : > { %v1797_v55 = vsel %vm906_vm5, %v942_v27, %v938_v43  ;;  %508 = vrot.lane.b32.xlu1 %v473_v29, %s1282_s29  ;;  %v276_v41 = vmul.f32 %v270_v12, %v270_v12  ;;  %v277_v34 = vmul.f32 %v271_v13, %v271_v13  ;;  %v241_v43 = vand.u32 2147483647, %v1814_v47 }
 0x129   : > { %v284_v39 = vadd.f32 %v277_v34, %v276_v41  ;;  %v239_v41 = vand.u32 2147483647, %v1830_v46  ;;  %v240_v34 = vand.u32 2147483647, %v1834_v4 }
 0x12a   : > { %551 = vrot.lane.b32.xlu0 %v478_v53, %s1281_s23  ;;  %v266_v53 = vsub.f32 %v1449_v0, %v1772_v21 }
 0x12b   : > { %545 = vrot.lane.b32.xlu1 %v472_v28, %s1281_s23  ;;  %v281_v28 = vadd.f32 %v275_v54, %v274_v50 }
 0x12c   : > { %v272_v45 = vmul.f32 %v266_v53, %v266_v53  ;;  %v223_v53 = vsub.f32 %v1510_v11, %v1507_v10 }
 0x12e   : > { %563 = vrot.lane.b32.xlu0 %v479_v31, %s1281_s23 }
 0x12f   : > { %557 = vrot.lane.b32.xlu1 %v473_v29, %s1281_s23 }
 0x132   : > { %684 = vrot.lane.b32.xlu0 %v1670_v30, %s1282_s29 }
 0x133   : > { %678 = vrot.lane.b32.xlu1 %v1685_v42, %s1282_s29 }
 0x136   : > { %696 = vrot.lane.b32.xlu0 %v1700_v56, %s1282_s29 }
 0x137   : > { %690 = vrot.lane.b32.xlu1 %v1712_v20, %s1282_s29 }
 0x148   : > { %v605_v36 = vpop.permute.xlu1 %604 }
 0x149   : > { %v603_v40 = vpop.permute.xlu0 %602 }
 0x14d   : > { %v609_v2 = vpop.permute.xlu1 %608  ;;  %v611_v6 = vpop.permute.xlu0 %610 }
 0x151   : > { %v615_v22 = vpop.permute.xlu1 %614  ;;  %v617_v38 = vpop.permute.xlu0 %616 }
 0x152   : > { %v1866_v49 = vsel %vm565_vm8, %v603_v40, %v615_v22  ;;  %v632_v0 = vsel %vm565_vm8, %v615_v22, %v603_v40  ;;  %v627_v60 = vsel %vm565_vm8, %v605_v36, %v617_v38  ;;  %v633_v32 = vsel %vm565_vm8, %v617_v38, %v605_v36 }
 0x153   : > { %v638_v27 = vsel %vm1846_vm7, %v632_v0, 0.0  ;;  %v639_v7 = vsel %vm1840_vm6, %v1866_v49, 0.0  ;;  %v640_v21 = vsel %vm1846_vm7, %v633_v32, 0.0  ;;  %v641_v59 = vsel %vm1840_vm6, %v627_v60, 0.0 }
 0x154   : > { %v1883_v31 = vadd.f32 %v650_v16, %v638_v27  ;;  %v1885_v44 = vadd.f32 %v652_v5, %v640_v21  ;;  %v1887_v29 = vadd.f32 %v653_v52, %v641_v59  ;;  %v278_v22 = vadd.f32 %v273_v35, %v272_v45 }
 0x155   : > { %282 = vadd.xlane.f32.xlu0 %v281_v28  ;;  %v621_v36 = vpop.permute.xlu1 %620  ;;  %v623_v40 = vpop.permute.xlu0 %622  ;;  %v230_v28 = vadd.f32 %v225_v15, %v224_v63  ;;  %v245_v32 = vadd.f32 %v240_v34, %v239_v41  ;;  %v657_v34 = vmul.f32 2.0, %v1644_v19 }
 0x156   : > { %v1893_v50 = vsel %vm565_vm8, %v609_v2, %v621_v36  ;;  %v635_v54 = vsel %vm565_vm8, %v621_v36, %v609_v2  ;;  %v1899_v12 = vsel %vm565_vm8, %v611_v6, %v623_v40  ;;  %v636_v47 = vsel %vm565_vm8, %v623_v40, %v611_v6 }
 0x157   : > { %v644_v13 = vsel %vm1846_vm7, %v635_v54, 0.0  ;;  %v645_v57 = vsel %vm1840_vm6, %v1893_v50, 0.0  ;;  %v646_v5 = vsel %vm1846_vm7, %v636_v47, 0.0  ;;  %v647_v2 = vsel %vm1840_vm6, %v1899_v12, 0.0 }
 0x158   : > { %v1913_v16 = vadd.f32 %v656_v26, %v644_v13  ;;  %v1915_v52 = vadd.f32 %v658_v17, %v646_v5  ;;  %v222_v6 = vsub.f32 %v1500_v9, %v1497_v8  ;;  %v248_v26 = vadd.f32 %v242_v3, %v241_v43 }
 0x159   : > { %285 = vadd.xlane.f32.xlu0 %v284_v39  ;;  %v244_v17 = vand.u32 2147483647, %v223_v53  ;;  %v229_v9 = vmul.f32 %v223_v53, %v223_v53  ;;  %v1993_v20 = vadd.f32 %v657_v34, %v645_v57 }
 0x15a   : > { %v243_v51 = vand.u32 2147483647, %v222_v6  ;;  %v228_v8 = vmul.f32 %v222_v6, %v222_v6 }
 0x15b   : > { %279 = vadd.xlane.f32.xlu1 %v278_v22 }
 0x15c   : > { %v613_v38 = vpop.permute.xlu0 %612  ;;  %v251_v46 = vadd.f32 %v244_v17, %v243_v51  ;;  %v236_v59 = vadd.f32 %v229_v9, %v228_v8  ;;  %v1959_v51 = vmul.f32 2.0, %v1700_v56 }
 0x15d   : > { %234 = vadd.xlane.f32.xlu0 %v233_v33  ;;  %v607_v0 = vpop.permute.xlu1 %606 }
 0x15f   : > { %231 = vadd.xlane.f32.xlu1 %v230_v28  ;;  %v659_v28 = vmul.f32 2.0, %v1641_v18 }
 0x160   : > { %v625_v60 = vpop.permute.xlu0 %624 }
 0x161   : > { %v1925_v10 = vsel %vm565_vm8, %v613_v38, %v625_v60  ;;  %v1929_v11 = vsel %vm565_vm8, %v625_v60, %v613_v38  ;;  %249 = vadd.xlane.f32.xlu0 %v248_v26  ;;  %v619_v4 = vpop.permute.xlu1 %618  ;;  %v651_v38 = vmul.f32 2.0, %v1624_v61  ;;  %v1956_v26 = vmul.f32 2.0, %v1670_v30 }
 0x162   : > { %v649_v33 = vsel %vm1840_vm6, %v1925_v10, 0.0  ;;  %v1936_v63 = vsel %vm565_vm8, %v607_v0, %v619_v4  ;;  %v1940_v15 = vsel %vm565_vm8, %v619_v4, %v607_v0 }
 0x163   : > { %v643_v27 = vsel %vm1840_vm6, %v1936_v63, 0.0  ;;  %246 = vadd.xlane.f32.xlu1 %v245_v32  ;;  %v663_v60 = vadd.f32 %v651_v38, %v639_v7 }
 0x164   : > { %v495_v21 = vpop.permute.xlu0 %494 }
 0x165   : > { %252 = vadd.xlane.f32.xlu0 %v251_v46  ;;  %v505_v43 = vpop.permute.xlu1 %504 }
 0x167   : > { %237 = vadd.xlane.f32.xlu1 %v236_v59 }
 0x168   : > { %v501_v36 = vpop.permute.xlu0 %500 }
 0x169   : > { %v493_v40 = vpop.permute.xlu1 %492 }
 0x16a   : > { %v517_v61 = vsel %vm516_vm9, %v493_v40, %v505_v43  ;;  %v523_v18 = vsel %vm516_vm9, %v505_v43, %v493_v40 }
 0x16b   : > { %v529_v9 = vsel %vm1963_vm11, %v517_v61, 0.0  ;;  %v530_v49 = vsel %vm1948_vm10, %v523_v18, 0.0 }
 0x16c   : > { %v507_v39 = vpop.permute.xlu0 %506 }
 0x16d   : > { %v499_v45 = vpop.permute.xlu1 %498  ;;  %v518_v42 = vsel %vm516_vm9, %v495_v21, %v507_v39  ;;  %v524_v32 = vsel %vm516_vm9, %v507_v39, %v495_v21 }
 0x16e   : > { %v531_v43 = vsel %vm1963_vm11, %v518_v42, 0.0  ;;  %v532_v40 = vsel %vm1948_vm10, %v524_v32, 0.0 }
 0x170   : > { %v513_v35 = vpop.permute.xlu0 %512 }
 0x171   : > { %v511_v3 = vpop.permute.xlu1 %510  ;;  %v521_v39 = vsel %vm516_vm9, %v501_v36, %v513_v35 }
 0x174   : > { %v544_v54 = vpop.permute.xlu0 %543 }
 0x175   : > { %v542_v47 = vpop.permute.xlu1 %541 }
 0x178   : > { %v550_v13 = vpop.permute.xlu0 %549 }
 0x179   : > { %v548_v5 = vpop.permute.xlu1 %547 }
 0x17c   : > { %v556_v6 = vpop.permute.xlu0 %555 }
 0x17d   : > { %v554_v53 = vpop.permute.xlu1 %553  ;;  %v567_v19 = vsel %vm565_vm8, %v544_v54, %v556_v6  ;;  %v573_v30 = vsel %vm565_vm8, %v556_v6, %v544_v54  ;;  %v527_v54 = vsel %vm516_vm9, %v513_v35, %v501_v36  ;;  %v526_v6 = vsel %vm516_vm9, %v511_v3, %v499_v45 }
 0x17e   : > { %v566_v17 = vsel %vm565_vm8, %v542_v47, %v554_v53  ;;  %v572_v0 = vsel %vm565_vm8, %v554_v53, %v542_v47  ;;  %v580_v7 = vsel %vm1846_vm7, %v573_v30, 0.0  ;;  %v581_v50 = vsel %vm1840_vm6, %v567_v19, 0.0 }
 0x17f   : > { %v578_v57 = vsel %vm1846_vm7, %v572_v0, 0.0  ;;  %v579_v46 = vsel %vm1840_vm6, %v566_v17, 0.0  ;;  %v520_v47 = vsel %vm516_vm9, %v499_v45, %v511_v3  ;;  %v593_v53 = vsub.f32 %v532_v40, %v581_v50 }
 0x180   : > { %v562_v41 = vpop.permute.xlu0 %561  ;;  %v591_v34 = vsub.f32 %v530_v49, %v579_v46  ;;  %v671_v36 = vadd.f32 %v659_v28, %v647_v2  ;;  %v648_v45 = vsel %vm1846_vm7, %v1929_v11, 0.0  ;;  %v537_v35 = vsel %vm1963_vm11, %v521_v39, 0.0 }
 0x181   : > { %v560_v56 = vpop.permute.xlu1 %559  ;;  %v570_v4 = vsel %vm565_vm8, %v550_v13, %v562_v41  ;;  %v576_v21 = vsel %vm565_vm8, %v562_v41, %v550_v13  ;;  %v592_v13 = vsub.f32 %v531_v43, %v580_v7  ;;  %v590_v41 = vsub.f32 %v529_v9, %v578_v57 }
 0x182   : > { %v586_v61 = vsel %vm1846_vm7, %v576_v21, 0.0  ;;  %v587_v18 = vsel %vm1840_vm6, %v570_v4, 0.0  ;;  %v538_v3 = vsel %vm1948_vm10, %v527_v54, 0.0  ;;  %v535_v30 = vsel %vm1963_vm11, %v520_v47, 0.0 }
 0x183   : > { %v536_v17 = vsel %vm1948_vm10, %v526_v6, 0.0  ;;  %v569_v12 = vsel %vm565_vm8, %v548_v5, %v560_v56  ;;  %v575_v2 = vsel %vm565_vm8, %v560_v56, %v548_v5  ;;  %v736_v28 = vmul.f32 %v592_v13, %v592_v13 }
 0x184   : > { %v677_v8 = vpop.permute.xlu0 %676  ;;  %v737_v0 = vmul.f32 %v593_v53, %v593_v53  ;;  %v598_v42 = vsub.f32 %v537_v35, %v586_v61  ;;  %v599_v32 = vsub.f32 %v538_v3, %v587_v18  ;;  %v734_v49 = vmul.f32 %v590_v41, %v590_v41 }
 0x185   : > { %v675_v59 = vpop.permute.xlu1 %674  ;;  %v735_v7 = vmul.f32 %v591_v34, %v591_v34  ;;  %v584_v46 = vsel %vm1846_vm7, %v575_v2, 0.0  ;;  %v585_v4 = vsel %vm1840_vm6, %v569_v12, 0.0  ;;  %v2143_v11 = vadd.f32 %v1959_v51, %v649_v33 }
 0x186   : > { %v742_v54 = vmul.f32 %v598_v42, %v598_v42  ;;  %v743_v47 = vmul.f32 %v599_v32, %v599_v32  ;;  %v596_v61 = vsub.f32 %v535_v30, %v584_v46  ;;  %v597_v18 = vsub.f32 %v536_v17, %v585_v4 }
 0x188   : > { %v683_v38 = vpop.permute.xlu0 %682 }
 0x189   : > { %v681_v19 = vpop.permute.xlu1 %680 }
 0x18c   : > { %v689_v9 = vpop.permute.xlu0 %688 }
 0x18d   : > { %v699_v50 = vsel %vm516_vm9, %v677_v8, %v689_v9  ;;  %v705_v57 = vsel %vm516_vm9, %v689_v9, %v677_v8  ;;  %v687_v21 = vpop.permute.xlu1 %686 }
 0x18e   : > { %v712_v5 = vsel %vm1963_vm11, %v699_v50, 0.0  ;;  %v713_v56 = vsel %vm1948_vm10, %v705_v57, 0.0  ;;  %v698_v8 = vsel %vm516_vm9, %v675_v59, %v687_v21  ;;  %v704_v39 = vsel %vm516_vm9, %v687_v21, %v675_v59 }
 0x18f   : > { %v724_v43 = vadd.f32 %v712_v5, %v1885_v44  ;;  %v725_v40 = vadd.f32 %v713_v56, %v1887_v29  ;;  %v710_v6 = vsel %vm1963_vm11, %v698_v8, 0.0  ;;  %v711_v13 = vsel %vm1948_vm10, %v704_v39, 0.0 }
 0x190   : > { %v695_v53 = vpop.permute.xlu0 %694  ;;  %v722_v44 = vadd.f32 %v710_v6, %v1883_v31  ;;  %v723_v29 = vadd.f32 %v711_v13, %v663_v60  ;;  %v741_v8 = vmul.f32 %v597_v18, %v597_v18 }
 0x191   : > { %v748_v41 = vmul.f32 %v724_v43, %v724_v43  ;;  %v749_v34 = vmul.f32 %v725_v40, %v725_v40  ;;  %v702_v35 = vsel %vm516_vm9, %v683_v38, %v695_v53  ;;  %v708_v59 = vsel %vm516_vm9, %v695_v53, %v683_v38  ;;  %v693_v3 = vpop.permute.xlu1 %692 }
 0x192   : > { %v746_v42 = vmul.f32 %v722_v44, %v722_v44  ;;  %v747_v32 = vmul.f32 %v723_v29, %v723_v29  ;;  %v718_v9 = vsel %vm1963_vm11, %v702_v35, 0.0  ;;  %v719_v31 = vsel %vm1948_vm10, %v708_v59, 0.0 }
 0x193   : > { %v760_v12 = vadd.f32 %v748_v41, %v736_v28  ;;  %v761_v2 = vadd.f32 %v749_v34, %v737_v0  ;;  %v701_v60 = vsel %vm516_vm9, %v681_v19, %v693_v3  ;;  %v707_v30 = vsel %vm516_vm9, %v693_v3, %v681_v19 }
 0x194   : > { %v503_v17 = vpop.permute.xlu0 %502  ;;  %v758_v28 = vadd.f32 %v746_v42, %v734_v49  ;;  %v759_v0 = vadd.f32 %v747_v32, %v735_v7  ;;  %v730_v57 = vadd.f32 %v718_v9, %v1915_v52  ;;  %v731_v46 = vadd.f32 %v719_v31, %v671_v36 }
 0x195   : > { %v2085_v50 = vadd.f32 1e-06, %v760_v12  ;;  %v2087_v38 = vadd.f32 1e-06, %v761_v2  ;;  %v716_v4 = vsel %vm1963_vm11, %v701_v60, 0.0  ;;  %v717_v5 = vsel %vm1948_vm10, %v707_v30, 0.0  ;;  %v497_v56 = vpop.permute.xlu1 %496 }
 0x196   : > { %v2095_v19 = vadd.f32 1e-06, %v758_v28  ;;  %v2097_v21 = vadd.f32 1e-06, %v759_v0  ;;  %v728_v43 = vadd.f32 %v716_v4, %v1913_v16  ;;  %v754_v49 = vmul.f32 %v730_v57, %v730_v57 }
 0x197   : > { %1149 = vrsqrt.f32 %v2085_v50  ;;  %v755_v52 = vmul.f32 %v731_v46, %v731_v46  ;;  %v729_v36 = vadd.f32 %v717_v5, %v1993_v20  ;;  %v740_v40 = vmul.f32 %v596_v61, %v596_v61 }
 0x198   : > { %1151 = vrsqrt.f32 %v2087_v38  ;;  %v515_v7 = vpop.permute.xlu0 %514  ;;  %v752_v39 = vmul.f32 %v728_v43, %v728_v43  ;;  %v766_v6 = vadd.f32 %v754_v49, %v742_v54  ;;  %v642_v16 = vsel %vm1846_vm7, %v1940_v15, 0.0 }
 0x199   : > { %1153 = vrsqrt.f32 %v2095_v19  ;;  %v767_v13 = vadd.f32 %v755_v52, %v743_v47  ;;  %v753_v53 = vmul.f32 %v729_v36, %v729_v36  ;;  %v509_v41 = vpop.permute.xlu1 %508  ;;  %v522_v20 = vsel %vm516_vm9, %v503_v17, %v515_v7 }
 0x19a   : > { %1155 = vrsqrt.f32 %v2097_v21  ;;  %v764_v34 = vadd.f32 %v752_v39, %v740_v40  ;;  %v528_v44 = vsel %vm516_vm9, %v515_v7, %v503_v17  ;;  %v2111_v29 = vadd.f32 1e-06, %v766_v6 }
 0x19b   : > { %v2113_v61 = vadd.f32 1e-06, %v767_v13  ;;  %v765_v18 = vadd.f32 %v753_v53, %v741_v8  ;;  %v519_v54 = vsel %vm516_vm9, %v497_v56, %v509_v41  ;;  %v2122_v15 = vadd.f32 %v1956_v26, %v648_v45 }
 0x19c   : > { %v552_v47 = vpop.permute.xlu0 %551  ;;  %v2124_v35 = vadd.f32 1e-06, %v764_v34  ;;  %v525_v59 = vsel %vm516_vm9, %v509_v41, %v497_v56  ;;  %v2129_v3 = vadd.f32 %v1979_v48, %v642_v16  ;;  %v2136_v12 = vadd.f32 %v1976_v58, %v643_v27 }
 0x19d   : > { %1157 = vrsqrt.f32 %v2111_v29  ;;  %v546_v26 = vpop.permute.xlu1 %545  ;;  %v539_v48 = vsel %vm1963_vm11, %v522_v20, 0.0  ;;  %v540_v63 = vsel %vm1948_vm10, %v528_v44, 0.0  ;;  %v533_v27 = vsel %vm1963_vm11, %v519_v54, 0.0 }
 0x19e   : > { %1159 = vrsqrt.f32 %v2113_v61  ;;  %v2153_v58 = vadd.f32 1e-06, %v765_v18  ;;  %v534_v10 = vsel %vm1948_vm10, %v525_v59, 0.0  ;;  %vm798_vm12 = vcmp.eq.f32.partialorder %v2085_v50, inf }
 0x19f   : > { %1161 = vrsqrt.f32 %v2124_v35  ;;  %vm800_vm13 = vcmp.eq.f32.partialorder %v2085_v50, 0.0  ;;  %v801_v2 = vand.u32 2147483648, %v2085_v50  ;;  %vm805_vm14 = vcmp.eq.f32.partialorder %v2087_v38, inf }
 0x1a0   : > { %v564_v33 = vpop.permute.xlu0 %563  ;;  %vm807_vm15 = vcmp.eq.f32.partialorder %v2087_v38, 0.0  ;;  %1163 = vrsqrt.f32 %v2153_v58  ;;  %v808_v4 = vand.u32 2147483648, %v2087_v38  ;;  %vm840_vm0 = vcmp.eq.f32.partialorder %v2111_v29, inf }
 0x1a1   : > { %v571_v51 = vsel %vm565_vm8, %v552_v47, %v564_v33  ;;  %v577_v45 = vsel %vm565_vm8, %v564_v33, %v552_v47  ;;  %v558_v9 = vpop.permute.xlu1 %557  ;;  %v843_v49 = vand.u32 2147483648, %v2111_v29  ;;  %v850_v52 = vand.u32 2147483648, %v2113_v61 }
 0x1a2   : > { %v588_v42 = vsel %vm1846_vm7, %v577_v45, 0.0  ;;  %v589_v32 = vsel %vm1840_vm6, %v571_v51, 0.0  ;;  %v568_v30 = vsel %vm565_vm8, %v546_v26, %v558_v9  ;;  %v574_v17 = vsel %vm565_vm8, %v558_v9, %v546_v26 }
 0x1a3   : > { %v600_v31 = vsub.f32 %v539_v48, %v588_v42  ;;  %v601_v60 = vsub.f32 %v540_v63, %v589_v32  ;;  %v582_v0 = vsel %vm1846_vm7, %v574_v17, 0.0  ;;  %v583_v57 = vsel %vm1840_vm6, %v568_v30, 0.0 }
 0x1a4   : > { %v1150_v28 = vpop.eup %1149  ;;  %v685_v46 = vpop.permute.xlu0 %684  ;;  %v594_v56 = vsub.f32 %v533_v27, %v582_v0  ;;  %v595_v43 = vsub.f32 %v534_v10, %v583_v57  ;;  %vm784_vm1 = vcmp.eq.f32.partialorder %v2095_v19, inf  ;;  %vm842_vm2 = vcmp.eq.f32.partialorder %v2111_v29, 0.0 }
 0x1a5   : > { %v1152_v5 = vpop.eup %1151  ;;  %v744_v7 = vmul.f32 %v600_v31, %v600_v31  ;;  %v679_v40 = vpop.permute.xlu1 %678  ;;  %v797_v1 = vmul.f32 %v1150_v28, %v2085_v50  ;;  %v745_v39 = vmul.f32 %v601_v60, %v601_v60  ;;  %vm847_vm3 = vcmp.eq.f32.partialorder %v2113_v61, inf }
 0x1a6   : > { %v1154_v36 = vpop.eup %1153  ;;  %v804_v14 = vmul.f32 %v1152_v5, %v2087_v38  ;;  %v738_v6 = vmul.f32 %v594_v56, %v594_v56  ;;  %v787_v13 = vand.u32 2147483648, %v2095_v19  ;;  %vm791_vm6 = vcmp.eq.f32.partialorder %v2097_v21, inf }
 0x1a7   : > { %v1156_v8 = vpop.eup %1155  ;;  %v739_v53 = vmul.f32 %v595_v43, %v595_v43  ;;  %v799_v16 = vsel %vm798_vm12, %v2085_v50, %v797_v1  ;;  %v783_v20 = vmul.f32 %v1154_v36, %v2095_v19  ;;  %vm849_vm7 = vcmp.eq.f32.partialorder %v2113_v61, 0.0 }
 0x1a8   : > { %v697_v41 = vpop.permute.xlu0 %696  ;;  %v806_v34 = vsel %vm805_vm14, %v2087_v38, %v804_v14  ;;  %v790_v54 = vmul.f32 %v1156_v8, %v2097_v21  ;;  %v794_v47 = vand.u32 2147483648, %v2097_v21  ;;  %v802_v63 = vsel %vm800_vm13, %v801_v2, %v799_v16 }
 0x1a9   : > { %v703_v44 = vsel %vm516_vm9, %v685_v46, %v697_v41  ;;  %v709_v18 = vsel %vm516_vm9, %v697_v41, %v685_v46  ;;  %v691_v48 = vpop.permute.xlu1 %690  ;;  %v809_v27 = vsel %vm807_vm15, %v808_v4, %v806_v34  ;;  %vm786_vm8 = vcmp.eq.f32.partialorder %v2095_v19, 0.0 }
 0x1aa   : > { %v720_v59 = vsel %vm1963_vm11, %v703_v44, 0.0  ;;  %v721_v26 = vsel %vm1948_vm10, %v709_v18, 0.0  ;;  %v1158_v10 = vpop.eup %1157  ;;  %v700_v45 = vsel %vm516_vm9, %v679_v40, %v691_v48  ;;  %v706_v42 = vsel %vm516_vm9, %v691_v48, %v679_v40 }
 0x1ab   : > { %v732_v33 = vadd.f32 %v720_v59, %v2122_v15  ;;  %v733_v51 = vadd.f32 %v721_v26, %v2143_v11  ;;  %v1160_v32 = vpop.eup %1159  ;;  %v714_v9 = vsel %vm1963_vm11, %v700_v45, 0.0  ;;  %v715_v50 = vsel %vm1948_vm10, %v706_v42, 0.0 }
 0x1ac   : > { %v839_v38 = vmul.f32 %v1158_v10, %v2111_v29  ;;  %v785_v15 = vsel %vm784_vm1, %v2095_v19, %v783_v20  ;;  %v1162_v11 = vpop.eup %1161  ;;  %v726_v24 = vadd.f32 %v714_v9, %v2129_v3  ;;  %v727_v60 = vadd.f32 %v715_v50, %v2136_v12 }
 0x1ad   : > { %v756_v2 = vmul.f32 %v732_v33, %v732_v33  ;;  %v757_v31 = vmul.f32 %v733_v51, %v733_v51  ;;  %v846_v37 = vmul.f32 %v1160_v32, %v2113_v61  ;;  %v792_v30 = vsel %vm791_vm6, %v2097_v21, %v790_v54  ;;  %v1164_v4 = vpop.eup %1163 }
 0x1ae   : > { %v841_v22 = vsel %vm840_vm0, %v2111_v29, %v839_v38  ;;  %v825_v17 = vmul.f32 %v1162_v11, %v2124_v35  ;;  %v750_v57 = vmul.f32 %v726_v24, %v726_v24  ;;  %v751_v46 = vmul.f32 %v727_v60, %v727_v60 }
 0x1af   : > { %v768_v28 = vadd.f32 %v756_v2, %v744_v7  ;;  %v769_v0 = vadd.f32 %v757_v31, %v745_v39  ;;  %v844_v3 = vsel %vm842_vm2, %v843_v49, %v841_v22  ;;  %v848_v12 = vsel %vm847_vm3, %v2113_v61, %v846_v37 }
 0x1b0   : > { %vm826_vm9 = vcmp.eq.f32.partialorder %v2124_v35, inf  ;;  %vm828_vm10 = vcmp.eq.f32.partialorder %v2124_v35, 0.0  ;;  %v762_v43 = vadd.f32 %v750_v57, %v738_v6  ;;  %v763_v36 = vadd.f32 %v751_v46, %v739_v53 }
 0x1b1   : > { %v780_v5 = vadd.f32 1e-06, %v768_v28  ;;  %v781_v56 = vadd.f32 1e-06, %v769_v0  ;;  %v851_v7 = vsel %vm849_vm7, %v850_v52, %v848_v12  ;;  %v868_v29 = vsub.f32 %v802_v63, %v844_v3 }
 0x1b2   : > { %v827_v49 = vsel %vm826_vm9, %v2124_v35, %v825_v17  ;;  %v829_v40 = vand.u32 2147483648, %v2124_v35  ;;  %v774_v1 = vadd.f32 1e-06, %v762_v43  ;;  %v775_v14 = vadd.f32 1e-06, %v763_v36 }
 0x1b3   : > { %1165 = vrsqrt.f32 %v780_v5  ;;  %v869_v8 = vsub.f32 %v809_v27, %v851_v7  ;;  %v874_v39 = vmul.f32 %v868_v29, %v868_v29  ;;  %v832_v53 = vmul.f32 %v1164_v4, %v2153_v58 }
 0x1b4   : > { %1167 = vrsqrt.f32 %v781_v56  ;;  %v830_v6 = vsel %vm828_vm10, %v829_v40, %v827_v49  ;;  %v788_v61 = vsel %vm786_vm8, %v787_v13, %v785_v15  ;;  %vm833_vm11 = vcmp.eq.f32.partialorder %v2153_v58, inf }
 0x1b5   : > { %1169 = vrsqrt.f32 %v774_v1  ;;  %v875_v41 = vmul.f32 %v869_v8, %v869_v8  ;;  %v834_v52 = vsel %vm833_vm11, %v2153_v58, %v832_v53  ;;  %v836_v16 = vand.u32 2147483648, %v2153_v58 }
 0x1b6   : > { %1171 = vrsqrt.f32 %v775_v14  ;;  %v866_v34 = vsub.f32 %v788_v61, %v830_v6  ;;  %vm793_vm12 = vcmp.eq.f32.partialorder %v2097_v21, 0.0  ;;  %vm835_vm13 = vcmp.eq.f32.partialorder %v2153_v58, 0.0 }
 0x1b7   : > { %v881_v20 = vadd.f32 %v875_v41, %v874_v39  ;;  %v795_v35 = vsel %vm793_vm12, %v794_v47, %v792_v30  ;;  %v837_v44 = vsel %vm835_vm13, %v836_v16, %v834_v52  ;;  %vm812_vm14 = vcmp.eq.f32.partialorder %v774_v1, inf }
 0x1b8   : > { %v867_v19 = vsub.f32 %v795_v35, %v837_v44  ;;  %v872_v13 = vmul.f32 %v866_v34, %v866_v34  ;;  %vm814_vm15 = vcmp.eq.f32.partialorder %v774_v1, 0.0  ;;  %v815_v48 = vand.u32 2147483648, %v774_v1 }
 0x1b9   : > { %882 = vadd.xlane.f32.xlu0 %v881_v20  ;;  %vm854_vm0 = vcmp.eq.f32.partialorder %v780_v5, inf  ;;  %vm856_vm1 = vcmp.eq.f32.partialorder %v780_v5, 0.0  ;;  %v857_v58 = vand.u32 2147483648, %v780_v5  ;;  %vm861_vm2 = vcmp.eq.f32.partialorder %v781_v56, inf }
 0x1ba   : > { %v873_v18 = vmul.f32 %v867_v19, %v867_v19  ;;  %v864_v51 = vand.u32 2147483648, %v781_v56  ;;  %vm863_vm3 = vcmp.eq.f32.partialorder %v781_v56, 0.0  ;;  %vm819_vm6 = vcmp.eq.f32.partialorder %v775_v14, inf }
 0x1bb   : > { %v822_v50 = vand.u32 2147483648, %v775_v14  ;;  %vm821_vm7 = vcmp.eq.f32.partialorder %v775_v14, 0.0 }
 0x1bc   : > { %v878_v54 = vadd.f32 %v873_v18, %v872_v13 }
 0x1be   : > { %879 = vadd.xlane.f32.xlu1 %v878_v54 }
 0x1c0   : > { %v1166_v59 = vpop.eup %1165 }
 0x1c1   : > { %v1168_v26 = vpop.eup %1167  ;;  %v853_v63 = vmul.f32 %v1166_v59, %v780_v5 }
 0x1c2   : > { %v1170_v27 = vpop.eup %1169  ;;  %v860_v10 = vmul.f32 %v1168_v26, %v781_v56 }
 0x1c3   : > { %v1172_v21 = vpop.eup %1171  ;;  %v811_v47 = vmul.f32 %v1170_v27, %v774_v1  ;;  %v855_v33 = vsel %vm854_vm0, %v780_v5, %v853_v63  ;;  %vm985_vm0 = vcmask 1042432  }
 0x1c4   : > { %v818_v45 = vmul.f32 %v1172_v21, %v775_v14  ;;  %v858_v42 = vsel %vm856_vm1, %v857_v58, %v855_v33  ;;  %v862_v32 = vsel %vm861_vm2, %v781_v56, %v860_v10  ;;  %vm987_vm1 = vcmask 1043456  }
 0x1c5   : > { %v813_v9 = vsel %vm812_vm14, %v774_v1, %v811_v47  ;;  %v865_v38 = vsel %vm863_vm3, %v864_v51, %v862_v32  ;;  %vm981_vm14 = vcmask 1040384   ;;  %vm989_vm2 = vcmask 192512  }
 0x1c6   : > { %v816_v15 = vsel %vm814_vm15, %v815_v48, %v813_v9  ;;  %v820_v11 = vsel %vm819_vm6, %v775_v14, %v818_v45  ;;  %vm983_vm15 = vcmask 1041408  }
 0x1c7   : > { %v823_v2 = vsel %vm821_vm7, %v822_v50, %v820_v11  ;;  %v870_v31 = vsub.f32 %v816_v15, %v858_v42 }
 0x1c8   : > { %v871_v24 = vsub.f32 %v823_v2, %v865_v38 }
 0x1c9   : > { %v876_v60 = vmul.f32 %v870_v31, %v870_v31 }
 0x1ca   : > { %v877_v22 = vmul.f32 %v871_v24, %v871_v24 }
 0x1cc   : > { %v884_v37 = vadd.f32 %v877_v22, %v876_v60 }
 0x1ce   : > { %885 = vadd.xlane.f32.xlu1 %v884_v37 }
 0x1de   : > { %v283_v30 = vpop.xlane.xlu0 %282 }
 0x1df   : > { %v288_v0 = vmul.f32 0.003921569, %v283_v30 }
 0x1e1   : > { %vm299_vm9 = vcmp.eq.f32.partialorder %v288_v0, inf  ;;  %v302_v52 = vand.u32 2147483648, %v288_v0  ;;  %vm301_vm11 = vcmp.eq.f32.partialorder %v288_v0, 0.0 }
 0x1e2   : > { %v286_v57 = vpop.xlane.xlu0 %285 }
 0x1e3   : > { %v289_v46 = vmul.f32 0.003921569, %v286_v57 }
 0x1e4   : > { %v280_v17 = vpop.xlane.xlu1 %279 }
 0x1e5   : > { %v287_v28 = vmul.f32 0.003921569, %v280_v17  ;;  %vm306_vm12 = vcmp.eq.f32.partialorder %v289_v46, inf  ;;  %v309_v19 = vand.u32 2147483648, %v289_v46  ;;  %vm308_vm13 = vcmp.eq.f32.partialorder %v289_v46, 0.0 }
 0x1e6   : > { %v235_v3 = vpop.xlane.xlu0 %234 }
 0x1e7   : > { %1173 = vrsqrt.f32 %v287_v28  ;;  %vm292_vm8 = vcmp.eq.f32.partialorder %v287_v28, inf  ;;  %vm294_vm10 = vcmp.eq.f32.partialorder %v287_v28, 0.0  ;;  %v295_v1 = vand.u32 2147483648, %v287_v28 }
 0x1e8   : > { %1175 = vrsqrt.f32 %v288_v0  ;;  %v232_v12 = vpop.xlane.xlu1 %231  ;;  %v898_v14 = vrot.slane %v235_v3, %v1781_v23 }
 0x1e9   : > { %1177 = vrsqrt.f32 %v289_v46  ;;  %v893_v39 = vrot.slane %v232_v12, %v1770_v62 }
 0x1ea   : > { %v250_v43 = vpop.xlane.xlu0 %249 }
 0x1eb   : > { %v919_v6 = vrot.slane %v250_v43, %v1781_v23  ;;  %v900_v13 = vsel %vm899_vm4, %v898_v14, %v893_v39 }
 0x1ec   : > { %v247_v36 = vpop.xlane.xlu1 %246 }
 0x1ed   : > { %v915_v53 = vrot.slane %v247_v36, %v1770_v62 }
 0x1ee   : > { %v253_v41 = vpop.xlane.xlu0 %252 }
 0x1ef   : > { %v924_v20 = vrot.slane %v253_v41, %v1774_v25  ;;  %v920_v18 = vsel %vm899_vm4, %v919_v6, %v915_v53 }
 0x1f0   : > { %v238_v61 = vpop.xlane.xlu1 %237 }
 0x1f1   : > { %v905_v35 = vrot.slane %v238_v61, %v1774_v25  ;;  %v925_v27 = vsel %vm906_vm5, %v924_v20, %v920_v18 }
 0x1f3   : > { %v907_v58 = vsel %vm906_vm5, %v905_v35, %v900_v13 }
 0x1f4   : > { %v1174_v4 = vpop.eup %1173  ;;  %v982_v51 = vsel %vm981_vm14, %v907_v58, %v925_v27 }
 0x1f5   : > { %v1176_v5 = vpop.eup %1175  ;;  %v291_v56 = vmul.f32 %v1174_v4, %v287_v28  ;;  %v984_v9 = vsel %vm983_vm15, %v982_v51, %v1797_v55 }
 0x1f6   : > { %v1178_v7 = vpop.eup %1177  ;;  %v298_v29 = vmul.f32 %v1176_v5, %v288_v0 }
 0x1f7   : > { %v293_v49 = vsel %vm292_vm8, %v287_v28, %v291_v56  ;;  %v305_v40 = vmul.f32 %v1178_v7, %v289_v46 }
 0x1f8   : > { %v300_v8 = vsel %vm299_vm9, %v288_v0, %v298_v29  ;;  %v296_v16 = vsel %vm294_vm10, %v295_v1, %v293_v49 }
 0x1f9   : > { %v307_v34 = vsel %vm306_vm12, %v289_v46, %v305_v40  ;;  %v303_v44 = vsel %vm301_vm11, %v302_v52, %v300_v8  ;;  %v951_v54 = vrot.slane %v296_v16, %v1770_v62 }
 0x1fa   : > { %v310_v48 = vsel %vm308_vm13, %v309_v19, %v307_v34  ;;  %v955_v63 = vrot.slane %v303_v44, %v1781_v23 }
 0x1fb   : > { %v960_v33 = vrot.slane %v310_v48, %v1774_v25 }
 0x1fc   : > { %v956_v10 = vsel %vm899_vm4, %v955_v63, %v951_v54 }
 0x1fd   : > { %v961_v45 = vsel %vm906_vm5, %v960_v33, %v956_v10 }
 0x242   : > { %v883_v59 = vpop.xlane.xlu0 %882 }
 0x243   : > { %v973_v21 = vrot.slane %v883_v59, %v1781_v23 }
 0x247   : > { %v880_v26 = vpop.xlane.xlu1 %879 }
 0x248   : > { %v969_v47 = vrot.slane %v880_v26, %v1770_v62  ;;  %v986_v62 = vsel %vm985_vm0, %v984_v9, %v961_v45 }
 0x24a   : > { %v974_v50 = vsel %vm899_vm4, %v973_v21, %v969_v47 }
 0x257   : > { %v886_v42 = vpop.xlane.xlu1 %885 }
 0x258   : > { %v978_v32 = vrot.slane %v886_v42, %v1774_v25 }
 0x25a   : > { %v979_v23 = vsel %vm906_vm5, %v978_v32, %v974_v50 }
 0x25b   : > { %v988_v38 = vsel %vm987_vm1, %v986_v62, %v979_v23 }
 0x25c   : > { %990 = vst.msk [vmem:[%s205_s27] sm:$0x1f] %vm989_vm2, %v988_v38 }
 0x25d PF: > { %p15_p11 = scmp.ge.s32.totalorder %s1320_s14, 4   ;;  %s2323_s9 = smov %s1265_s10 }
 0x25e   : > { %s2324_s10 = smov %s1269_s11  ;;  %s2325_s11 = smov %s1330_s17 }
 0x25f   : > { %s2326_s12 = smov %s1320_s14  ;;  %17 = sbr.rel (!%p15_p11) target bundleno = 5 (0x5), region = 81 }
 0x264   :  { %1010 = vsyncpa [#allocation3], 1 }
 0x265   :  { %1012 = vsyncpa [#allocation3 + $0x1], 1 }
 0x266   :  { %1013 = vsyncpa [#allocation5], 1 }
 0x267   :  { %1015 = vsyncpa [#allocation5 + $0x1], 1 }

</bundles_post_ra>
